<compile_context>
chip_gen: v5e
topology: v5e:2x2
jax: 0.10.0
libtpu: 0.0.40
codegen_flags: <defaults>
</compile_context>

<pallas_src>
import jax
import jax.numpy as jnp
from jax.experimental import pallas as pl
from jax.experimental.pallas import tpu as pltpu

_LANE = 128


def _cdiv(a: int, b: int) -> int:
    return -(-a // b)


def _round_up(n: int, m: int) -> int:
    return _cdiv(n, m) * m


def _mlp_kernel(x_ref,
                w1_ref, b1_ref,
                w2_ref, b2_ref,
                w3_ref, b3_ref,
                o_ref):
    """Fused (fc1+BN folded)+ReLU -> (fc2+BN folded)+ReLU -> fc3.

    Transposed layout: x_ref is (d_in, tb) bf16 with batch on the lane axis,
    weights are (out, in) bf16, biases (out, 1) f32, output (d_out, tb) f32.
    """
    # fc1 (+ folded BatchNorm) -> ReLU          (dropout = identity in eval)
    h1 = jnp.dot(w1_ref[...], x_ref[...],
                 preferred_element_type=jnp.float32) + b1_ref[...]
    h1 = jnp.maximum(h1.astype(jnp.bfloat16), 0.0)   # cast-then-ReLU (bf16 VPU)

    # fc2 (+ folded BatchNorm) -> ReLU          (dropout = identity in eval)
    h2 = jnp.dot(w2_ref[...], h1,
                 preferred_element_type=jnp.float32) + b2_ref[...]
    h2 = jnp.maximum(h2.astype(jnp.bfloat16), 0.0)

    # fc3 (logits, no activation) — (3, tb) lane-dense store.
    o_ref[...] = jnp.dot(w3_ref[...], h2,
                         preferred_element_type=jnp.float32) + b3_ref[...]


def cnn_forward(x, params, *, tile_b=16384, vmem_limit_bytes=None):
    """Run the fused MLP kernel.

    x: (B, input_size) or (B, 1, input_size), any float dtype (cast to bf16 at
    the boundary).  params: BN-folded parameters from `init_params`.
    Returns (B, 3) float32 logits.
    """
    if x.ndim == 3:
        # mirrors `x.squeeze(1)` in the PyTorch forward
        x = jnp.squeeze(x, axis=1)
    B, d_in = x.shape

    w1, b1, w2, b2, w3, b3 = params
    d_h1 = w1.shape[0]
    d_h2 = w2.shape[0]
    d_out = w3.shape[0]

    # --- batch tiling: batch lives on the lane axis --------------------------
    # Pad only to the 128-lane quantum, then split into equal 128-aligned
    # tiles.  Force >= 2 grid steps when possible so v7x megacore gets both
    # TensorCores busy (harmless extra ~0.35us on v5e/v6e).
    b_q = _round_up(max(B, 1), _LANE)
    max_tb = max(_LANE, _round_up(tile_b, _LANE))
    n_steps = _cdiv(b_q, max_tb)
    if n_steps == 1 and b_q >= 2 * _LANE:
        n_steps = 2
    tb = _round_up(_cdiv(b_q, n_steps), _LANE)
    b_pad = n_steps * tb

    # Host-side transpose + bf16 cast (cheap XLA ops; avoids an in-kernel
    # XLU transpose).  Padded batch columns are zeros; they produce relu(bias)
    # garbage that is sliced off below.
    xt = x.astype(jnp.bfloat16).T                      # (d_in, B)
    if b_pad != B:
        xt = jnp.pad(xt, ((0, 0), (0, b_pad - B)))     # (d_in, b_pad)

    grid = (n_steps,)

    def resident_spec(arr):
        # Full-array block, constant index_map -> fetched once, VMEM-resident.
        return pl.BlockSpec(arr.shape, lambda i: (0, 0))

    in_specs = [
        pl.BlockSpec((d_in, tb), lambda i: (0, i)),    # x^T: tiled over lanes
        resident_spec(w1), resident_spec(b1),
        resident_spec(w2), resident_spec(b2),
        resident_spec(w3), resident_spec(b3),
    ]
    out_specs = pl.BlockSpec((d_out, tb), lambda i: (0, i))   # lane-dense

    weight_bytes = sum(int(a.size) * a.dtype.itemsize
                       for a in (w1, b1, w2, b2, w3, b3))
    cost = pl.CostEstimate(
        flops=2 * b_pad * (d_in * d_h1 + d_h1 * d_h2 + d_h2 * d_out),
        transcendentals=0,
        bytes_accessed=b_pad * d_in * 2 + b_pad * d_out * 4 + weight_bytes,
    )

    compiler_params = pltpu.CompilerParams(
        dimension_semantics=("parallel",),   # megacore-shard the batch grid
        vmem_limit_bytes=vmem_limit_bytes,
    )

    out_t = pl.pallas_call(
        _mlp_kernel,
        out_shape=jax.ShapeDtypeStruct((d_out, b_pad), jnp.float32),
        grid=grid,
        in_specs=in_specs,
        out_specs=out_specs,
        compiler_params=compiler_params,
        cost_estimate=cost,
    )(xt, w1, b1, w2, b2, w3, b3)

    # Back to (B, d_out) row-major logits.
    return out_t.T[:B]


def init_params(key, input_size=10):
    """Parameter init matching the module's __init__ shapes, BN pre-folded.

    Returns (w1, b1, w2, b2, w3, b3) with weights stored (out, in) in bf16
    (nn.Linear's native layout) and biases (out, 1) in f32.  Any
    checkpoint-loading path must fold its real BatchNorm running stats /
    affine params the same way.
    """
    k1, k2, k3 = jax.random.split(key, 3)

    def linear_init(k, fan_in, fan_out):
        # Uniform(-1/sqrt(fan_in), 1/sqrt(fan_in)), like PyTorch nn.Linear.
        bound = 1.0 / jnp.sqrt(fan_in)
        kw, kb = jax.random.split(k)
        w = jax.random.uniform(kw, (fan_out, fan_in), jnp.float32, -bound, bound)
        b = jax.random.uniform(kb, (fan_out, 1), jnp.float32, -bound, bound)
        return w, b

    w1, b1 = linear_init(k1, input_size, 64)
    w2, b2 = linear_init(k2, 64, 32)
    w3, b3 = linear_init(k3, 32, 3)

    eps = 1e-5

    def bn_fold(w, b, n):
        # BatchNorm1d eval defaults: gamma=1, beta=0, running_mean=0, var=1.
        gamma = jnp.ones((n, 1), jnp.float32)
        beta = jnp.zeros((n, 1), jnp.float32)
        running_mean = jnp.zeros((n, 1), jnp.float32)
        running_var = jnp.ones((n, 1), jnp.float32)
        scale = gamma / jnp.sqrt(running_var + eps)
        shift = beta - running_mean * scale
        return w * scale, b * scale + shift

    w1, b1 = bn_fold(w1, b1, 64)
    w2, b2 = bn_fold(w2, b2, 32)

    return (w1.astype(jnp.bfloat16), b1,
            w2.astype(jnp.bfloat16), b2,
            w3.astype(jnp.bfloat16), b3)


def _reference(x, params):
    """Pure-JAX reference using the same bf16 operands / f32 accumulation."""
    # NOTE: bf16 operands + bf16 inter-layer casts deviate slightly from
    # PyTorch's f32 forward (within ~1e-3 for this tiny net).
    w1, b1, w2, b2, w3, b3 = params
    if x.ndim == 3:
        x = jnp.squeeze(x, axis=1)
    xr = x.astype(jnp.bfloat16)
    h1 = jnp.dot(xr, w1.T, preferred_element_type=jnp.float32) + b1.T
    h1 = jnp.maximum(h1.astype(jnp.bfloat16), 0.0)
    h2 = jnp.dot(h1, w2.T, preferred_element_type=jnp.float32) + b2.T
    h2 = jnp.maximum(h2.astype(jnp.bfloat16), 0.0)
    return jnp.dot(h2, w3.T, preferred_element_type=jnp.float32) + b3.T


if __name__ == "__main__":
    key = jax.random.PRNGKey(0)
    pkey, xkey, x2key = jax.random.split(key, 3)

    input_size = 10
    params = init_params(pkey, input_size=input_size)

    # TODO(synk): the PyTorch module also stashes intermediate activations in
    # `self.activations` (host-side .detach().cpu()); not reproduced here.

    # --- Small test: exercise the 3-D-input path the module squeezes --------
    batch = 8
    x = jax.random.normal(xkey, (batch, 1, input_size), dtype=jnp.float32)
    out = jax.block_until_ready(cnn_forward(x, params))
    ref = _reference(x, params)
    assert out.shape == (batch, 3)
    assert jnp.allclose(out, ref, atol=2e-3, rtol=2e-3)

    # --- Multi-tile test: batch not divisible by the tile -> padding path ---
    batch2 = 1000
    x2 = jax.random.normal(x2key, (batch2, input_size), dtype=jnp.float32)
    out2 = jax.block_until_ready(cnn_forward(x2, params, tile_b=256))
    ref2 = _reference(x2, params)
    assert out2.shape == (batch2, 3)
    assert jnp.allclose(out2, ref2, atol=2e-3, rtol=2e-3)

    print("KERNEL_OK")
</pallas_src>

<mosaic_0001>
module attributes {stable_mosaic.version = 11 : i64} {
  func.func @_mlp_kernel(%arg0: i32, %arg1: memref<10x128xbf16, #tpu.memory_space<vmem>>, %arg2: memref<64x10xbf16, #tpu.memory_space<vmem>>, %arg3: memref<64x1xf32, #tpu.memory_space<vmem>>, %arg4: memref<32x64xbf16, #tpu.memory_space<vmem>>, %arg5: memref<32x1xf32, #tpu.memory_space<vmem>>, %arg6: memref<3x32xbf16, #tpu.memory_space<vmem>>, %arg7: memref<3x1xf32, #tpu.memory_space<vmem>>, %arg8: memref<3x128xf32, #tpu.memory_space<vmem>>) attributes {dimension_semantics = [#tpu.dimension_semantics<parallel>], iteration_bounds = array<i64: 1>, scalar_prefetch = 0 : i64, scratch_operands = 0 : i64, tpu.core_type = #tpu.core_type<tc>, window_params = [{transform_indices = @transform_0, window_bounds = array<i64: 10, 128>}, {pipeline_mode = #tpu.pipeline_mode<synchronous>, transform_indices = @transform_1, window_bounds = array<i64: 64, 10>}, {pipeline_mode = #tpu.pipeline_mode<synchronous>, transform_indices = @transform_2, window_bounds = array<i64: 64, 1>}, {pipeline_mode = #tpu.pipeline_mode<synchronous>, transform_indices = @transform_3, window_bounds = array<i64: 32, 64>}, {pipeline_mode = #tpu.pipeline_mode<synchronous>, transform_indices = @transform_4, window_bounds = array<i64: 32, 1>}, {pipeline_mode = #tpu.pipeline_mode<synchronous>, transform_indices = @transform_5, window_bounds = array<i64: 3, 32>}, {pipeline_mode = #tpu.pipeline_mode<synchronous>, transform_indices = @transform_6, window_bounds = array<i64: 3, 1>}, {transform_indices = @transform_7, window_bounds = array<i64: 3, 128>}]} {
    %c0 = arith.constant 0 : index
    %c0_0 = arith.constant 0 : index
    %0 = vector.load %arg2[%c0, %c0_0] : memref<64x10xbf16, #tpu.memory_space<vmem>>, vector<64x10xbf16>
    %c0_1 = arith.constant 0 : index
    %c0_2 = arith.constant 0 : index
    %1 = vector.load %arg1[%c0_1, %c0_2] : memref<10x128xbf16, #tpu.memory_space<vmem>>, vector<10x128xbf16>
    %cst = arith.constant dense<0.000000e+00> : vector<64x128xf32>
    %2 = tpu.matmul %0, %1, %cst {dimension_numbers = #tpu.dot_dimension_numbers<[1], [0], [0], [1], [0, 0, 1, 1], [], []>} : vector<64x10xbf16>, vector<10x128xbf16>, vector<64x128xf32> -> vector<64x128xf32>
    %c0_3 = arith.constant 0 : index
    %c0_4 = arith.constant 0 : index
    %3 = vector.load %arg3[%c0_3, %c0_4] : memref<64x1xf32, #tpu.memory_space<vmem>>, vector<64x1xf32>
    %4 = vector.broadcast %3 : vector<64x1xf32> to vector<64x128xf32>
    %5 = arith.addf %2, %4 : vector<64x128xf32>
    %6 = arith.truncf %5 : vector<64x128xf32> to vector<64x128xbf16>
    %cst_5 = arith.constant 0.000000e+00 : bf16
    %7 = vector.broadcast %cst_5 : bf16 to vector<64x128xbf16>
    %8 = arith.maximumf %6, %7 : vector<64x128xbf16>
    %c0_6 = arith.constant 0 : index
    %c0_7 = arith.constant 0 : index
    %9 = vector.load %arg4[%c0_6, %c0_7] : memref<32x64xbf16, #tpu.memory_space<vmem>>, vector<32x64xbf16>
    %cst_8 = arith.constant dense<0.000000e+00> : vector<32x128xf32>
    %10 = tpu.matmul %9, %8, %cst_8 {dimension_numbers = #tpu.dot_dimension_numbers<[1], [0], [0], [1], [0, 0, 1, 1], [], []>} : vector<32x64xbf16>, vector<64x128xbf16>, vector<32x128xf32> -> vector<32x128xf32>
    %c0_9 = arith.constant 0 : index
    %c0_10 = arith.constant 0 : index
    %11 = vector.load %arg5[%c0_9, %c0_10] : memref<32x1xf32, #tpu.memory_space<vmem>>, vector<32x1xf32>
    %12 = vector.broadcast %11 : vector<32x1xf32> to vector<32x128xf32>
    %13 = arith.addf %10, %12 : vector<32x128xf32>
    %14 = arith.truncf %13 : vector<32x128xf32> to vector<32x128xbf16>
    %cst_11 = arith.constant 0.000000e+00 : bf16
    %15 = vector.broadcast %cst_11 : bf16 to vector<32x128xbf16>
    %16 = arith.maximumf %14, %15 : vector<32x128xbf16>
    %c0_12 = arith.constant 0 : index
    %c0_13 = arith.constant 0 : index
    %17 = vector.load %arg6[%c0_12, %c0_13] : memref<3x32xbf16, #tpu.memory_space<vmem>>, vector<3x32xbf16>
    %cst_14 = arith.constant dense<0.000000e+00> : vector<3x128xf32>
    %18 = tpu.matmul %17, %16, %cst_14 {dimension_numbers = #tpu.dot_dimension_numbers<[1], [0], [0], [1], [0, 0, 1, 1], [], []>} : vector<3x32xbf16>, vector<32x128xbf16>, vector<3x128xf32> -> vector<3x128xf32>
    %c0_15 = arith.constant 0 : index
    %c0_16 = arith.constant 0 : index
    %19 = vector.load %arg7[%c0_15, %c0_16] : memref<3x1xf32, #tpu.memory_space<vmem>>, vector<3x1xf32>
    %20 = vector.broadcast %19 : vector<3x1xf32> to vector<3x128xf32>
    %21 = arith.addf %18, %20 : vector<3x128xf32>
    %c0_17 = arith.constant 0 : index
    %c0_18 = arith.constant 0 : index
    %22 = vector.load %arg8[%c0_17, %c0_18] : memref<3x128xf32, #tpu.memory_space<vmem>>, vector<3x128xf32>
    tpu.vector_store %arg8[%c0_17, %c0_18], %21 {strides = array<i32>} : memref<3x128xf32, #tpu.memory_space<vmem>>, vector<3x128xf32>,
    return
  }
  func.func @transform_0(%arg0: i32) -> (i32, i32) {
    %c0_i32 = arith.constant 0 : i32
    %c0_i32_0 = arith.constant 0 : i32
    return %c0_i32, %arg0 : i32, i32
  }
  func.func @transform_1(%arg0: i32) -> (i32, i32) {
    %c0_i32 = arith.constant 0 : i32
    %c0_i32_0 = arith.constant 0 : i32
    %c0_i32_1 = arith.constant 0 : i32
    return %c0_i32, %c0_i32_0 : i32, i32
  }
  func.func @transform_2(%arg0: i32) -> (i32, i32) {
    %c0_i32 = arith.constant 0 : i32
    %c0_i32_0 = arith.constant 0 : i32
    %c0_i32_1 = arith.constant 0 : i32
    return %c0_i32, %c0_i32_0 : i32, i32
  }
  func.func @transform_3(%arg0: i32) -> (i32, i32) {
    %c0_i32 = arith.constant 0 : i32
    %c0_i32_0 = arith.constant 0 : i32
    %c0_i32_1 = arith.constant 0 : i32
    return %c0_i32, %c0_i32_0 : i32, i32
  }
  func.func @transform_4(%arg0: i32) -> (i32, i32) {
    %c0_i32 = arith.constant 0 : i32
    %c0_i32_0 = arith.constant 0 : i32
    %c0_i32_1 = arith.constant 0 : i32
    return %c0_i32, %c0_i32_0 : i32, i32
  }
  func.func @transform_5(%arg0: i32) -> (i32, i32) {
    %c0_i32 = arith.constant 0 : i32
    %c0_i32_0 = arith.constant 0 : i32
    %c0_i32_1 = arith.constant 0 : i32
    return %c0_i32, %c0_i32_0 : i32, i32
  }
  func.func @transform_6(%arg0: i32) -> (i32, i32) {
    %c0_i32 = arith.constant 0 : i32
    %c0_i32_0 = arith.constant 0 : i32
    %c0_i32_1 = arith.constant 0 : i32
    return %c0_i32, %c0_i32_0 : i32, i32
  }
  func.func @transform_7(%arg0: i32) -> (i32, i32) {
    %c0_i32 = arith.constant 0 : i32
    %c0_i32_0 = arith.constant 0 : i32
    return %c0_i32, %arg0 : i32, i32
  }
}

</mosaic_0001>

<bundles_post_ra>
// kernel: tpu_custom_call.1
= control target key start
LH: loop header
LB: loop body
LE: loop exit
PB: predicated region body
PF: predicated region fallthrough
CT: control target
= control target key end

     0   :  { %vm124_vm0 = vcmask 1044480   ;;  %v378_v3 = vmov 0   ;;  %vm111_vm1 = vcmask 80896   ;;  %s493_s0 = inlined_call_operand.vmem [shape: bf16[10,128], index: 0, kind: input, shape index: {}]   ;;  %s494_s1 = inlined_call_operand.vmem [shape: bf16[64,10], index: 1, kind: input, shape index: {}]   ;;  %s495_s2 = inlined_call_operand.vmem [shape: f32[64,1], index: 2, kind: input, shape index: {}]   ;;  %s496_s3 = inlined_call_operand.vmem [shape: bf16[32,64], index: 3, kind: input, shape index: {}]   ;;  %s497_s4 = inlined_call_operand.vmem [shape: f32[32,1], index: 4, kind: input, shape index: {}]   ;;  %s498_s5 = inlined_call_operand.vmem [shape: bf16[3,32], index: 5, kind: input, shape index: {}]   ;;  %s499_s6 = inlined_call_operand.vmem [shape: f32[3,1], index: 6, kind: input, shape index: {}]   ;;  %s500_s7 = inlined_call_operand.hbm [shape: f32[3,128], index: 7, kind: output, shape index: {}]  }
   0x1   :  { %v322_v0 = vld [vmem:[%s493_s0] sm:$0xf]  ;;  %v343_v1 = vld [vmem:[%s493_s0] sm:$0x10]  ;;  %349 = vset.pattern.permute.xlu0 %v378_v3  ;;  %v44_v4 = vld [vmem:[%s495_s2 + $0x30] sm:$0xff]  ;;  %350 = vset.pattern.permute.xlu1 %v378_v3 }
   0x2   :  { %v323_v2 = vor.u32 %v343_v1, %v322_v0  ;;  %78 = vperm.xlu0 %349, %v44_v4   ;;  %v42_v5 = vld [vmem:[%s495_s2 + $0x20] sm:$0xff]  ;;  %351 = vset.pattern.permute.xlu2 %v378_v3  ;;  %v341_v7 = vld [vmem:[%s494_s1 + $0x10] sm:$0xff] }
   0x3   :  { %v339_v8 = vld [vmem:[%s494_s1] sm:$0xff]  ;;  %68 = vperm.xlu1 %350, %v42_v5   ;;  %v40_v9 = vld [vmem:[%s495_s2 + $0x10] sm:$0xff] }
   0x4   :  { %v126_v6 = vsel %vm124_vm0, %v323_v2, 0  ;;  %58 = vperm.xlu2 %351, %v40_v9  }
   0x5   :  { %346 = vmatpush.bf16.msra.mxu3 %v126_v6  ;;  %135 = vmatpush.bf16.msra.mxu0 %v126_v6 }
   0x6   :  { %12 = vsyncpa [#allocation3], 0  ;;  %v45_v10 = vld [vmem:[%s495_s2 + $0x38] sm:$0xff]  ;;  %v43_v11 = vld [vmem:[%s495_s2 + $0x28] sm:$0xff]  ;;  %vm223_vm2 = vcmask 523264   ;;  %vm270_vm3 = vcmask 261120  }
   0x7   :  { %v41_v12 = vld [vmem:[%s495_s2 + $0x18] sm:$0xff]  ;;  %v38_v13 = vld [vmem:[%s495_s2] sm:$0xff]  ;;  %v39_v14 = vld [vmem:[%s495_s2 + $0x8] sm:$0xff]  ;;  %s379_s15 = smov [#allocation2]   ;;  %s295_s19 = sshll.u32 %s500_s7, 4  ;;  %s296_s19 = int_to_ptr.hbm [resolvable:$true] %s295_s19 }
   0x8   :  { %326 = vmatmul.msk.bf16.vlgmr.msra.gmra.mxu3 %vm111_vm1, %v341_v7  ;;  %324 = vmatmul.msk.bf16.vlgmr.msra.gmra.mxu0 %vm111_vm1, %v339_v8  ;;  %v342_v15 = vld [vmem:[%s494_s1 + $0x18] sm:$0xff]  ;;  %v340_v16 = vld [vmem:[%s494_s1 + $0x8] sm:$0xff]  ;;  %v191_v17 = vld [vmem:[%s497_s4 + $0x10] sm:$0xff]  ;;  %s293_s16 = sshll.u32 %s379_s15, 4  ;;  %s294_s16 = int_to_ptr.vmem [resolvable:$true] %s293_s16 }
   0x9   :  { %v192_v18 = vld [vmem:[%s497_s4 + $0x18] sm:$0xff]  ;;  %v189_v19 = vld [vmem:[%s497_s4] sm:$0xff]  ;;  %v190_v20 = vld [vmem:[%s497_s4 + $0x8] sm:$0xff] }
   0xa   :  { %83 = vperm.xlu0 %349, %v45_v10   ;;  %v264_v21 = vld [vmem:[%s499_s6] sm:$0x7]  ;;  %v345_v59 = vld [vmem:[%s496_s3 + $0x8] sm:$0xff] }
   0xb   :  { %73 = vperm.xlu1 %350, %v43_v11   ;;  %v344_v58 = vld [vmem:[%s496_s3] sm:$0xff] }
   0xc   :  { %63 = vperm.xlu2 %351, %v41_v12  }
  0x12   :  { %48 = vperm.xlu0 %349, %v38_v13  }
  0x13   :  { %53 = vperm.xlu1 %350, %v39_v14   ;;  %v263_v14 = vld [vmem:[%s498_s5] sm:$0x3] }
  0x14   :  { %205 = vperm.xlu2 %351, %v191_v17  }
  0x18   :  { %327 = vmatmul.msk.bf16.gmra.mxu3 %vm111_vm1, %v342_v15  ;;  %325 = vmatmul.msk.bf16.gmra.mxu0 %vm111_vm1, %v340_v16 }
  0x1a   :  { %210 = vperm.xlu0 %349, %v192_v18  }
  0x1b   :  { %195 = vperm.xlu1 %350, %v189_v19  }
  0x1c   :  { %200 = vperm.xlu2 %351, %v190_v20  }
  0x22   :  { %267 = vperm.xlu0 %349, %v264_v21  }
  0x5e   :  { %v59_v30 = vpop.permute.xlu2 %58 }
  0x66   :  { %v64_v41 = vpop.permute.xlu2 %63 }
  0x6e   :  { %v206_v62 = vpop.permute.xlu2 %205 }
  0x74   :  { %v79_v27 = vpop.permute.xlu0 %78 }
  0x75   :  { %v69_v26 = vpop.permute.xlu1 %68 }
  0x76   :  { %v201_v0 = vpop.permute.xlu2 %200 }
  0x7c   :  { %v84_v32 = vpop.permute.xlu0 %83 }
  0x7d   :  { %v74_v31 = vpop.permute.xlu1 %73 }
  0x84   :  { %v49_v47 = vpop.permute.xlu0 %48 }
  0x85   :  { %v137_v22 = vpop.f32.mrf.mxu0  ;;  %v54_v46 = vpop.permute.xlu1 %53 }
  0x86   :  { %v138_v49 = vadd.f32 %v137_v22, %v49_v47 }
  0x88   :  { %v173_v54 = vmax.f32 %v138_v49, 0.0 }
  0x8b   :  { %v147_v23 = vpop.f32.mrf.mxu3 }
  0x8c   :  { %v148_v38 = vadd.f32 %v147_v23, %v69_v26  ;;  %v211_v2 = vpop.permute.xlu0 %210 }
  0x8d   :  { %v139_v24 = vpop.f32.mrf.mxu0  ;;  %v196_v6 = vpop.permute.xlu1 %195 }
  0x8e   :  { %v177_v48 = vmax.f32 %v148_v38, 0.0  ;;  %v140_v50 = vadd.f32 %v139_v24, %v54_v46 }
  0x90   :  { %v174_v55 = vmax.f32 %v140_v50, 0.0 }
  0x92   :  { %v181_v57 = vpack.c.bf16 %v174_v55, %v173_v54 }
  0x93   :  { %v149_v25 = vpop.f32.mrf.mxu3 }
  0x94   :  { %v150_v35 = vadd.f32 %v149_v25, %v74_v31  ;;  %v268_v15 = vpop.permute.xlu0 %267 }
  0x95   :  { %v142_v28 = vpop.f32.mrf.mxu0 }
  0x96   :  { %v178_v42 = vmax.f32 %v150_v35, 0.0  ;;  %v143_v43 = vadd.f32 %v142_v28, %v59_v30 }
  0x98   :  { %v175_v51 = vmax.f32 %v143_v43, 0.0  ;;  %v183_v53 = vpack.c.bf16 %v178_v42, %v177_v48 }
  0x9b   :  { %v152_v29 = vpop.f32.mrf.mxu3 }
  0x9c   :  { %v153_v33 = vadd.f32 %v152_v29, %v79_v27 }
  0x9d   :  { %v144_v37 = vpop.f32.mrf.mxu0 }
  0x9e   :  { %v179_v39 = vmax.f32 %v153_v33, 0.0  ;;  %v145_v44 = vadd.f32 %v144_v37, %v64_v41 }
  0xa0   :  { %v176_v52 = vmax.f32 %v145_v44, 0.0 }
  0xa2   :  { %v182_v56 = vpack.c.bf16 %v176_v52, %v175_v51 }
  0xa3   :  { %v154_v34 = vpop.f32.mrf.mxu3 }
  0xa4   :  { %v155_v36 = vadd.f32 %v154_v34, %v84_v32 }
  0xa6   :  { %v180_v40 = vmax.f32 %v155_v36, 0.0 }
  0xa8   :  { %v184_v45 = vpack.c.bf16 %v180_v40, %v179_v39 }
  0xaa   :  { %234 = vmatpush.bf16.msra.mxu1 %v184_v45 }
  0xae   :  { %235 = vmatpush.bf16.msra.mxu1 %v183_v53 }
  0xb2   :  { %236 = vmatpush.bf16.msra.mxu1 %v182_v56 }
  0xb6   :  { %237 = vmatpush.bf16.msra.mxu1 %v181_v57 }
  0xb9   :  { %336 = vmatmul.msk.bf16.vlgmr.msra.gmra.mxu1 %vm223_vm2, %v344_v58 }
  0xc9   :  { %337 = vmatmul.msk.bf16.gmra.mxu1 %vm223_vm2, %v345_v59 }
 0x136   :  { %v239_v60 = vpop.f32.mrf.mxu1 }
 0x137   :  { %v240_v7 = vadd.f32 %v239_v60, %v196_v6 }
 0x139   :  { %v257_v12 = vmax.f32 %v240_v7, 0.0 }
 0x13e   :  { %v241_v61 = vpop.f32.mrf.mxu1 }
 0x13f   :  { %v242_v4 = vadd.f32 %v241_v61, %v201_v0 }
 0x141   :  { %v258_v10 = vmax.f32 %v242_v4, 0.0 }
 0x143   :  { %v261_v13 = vpack.c.bf16 %v258_v10, %v257_v12 }
 0x146   :  { %v244_v63 = vpop.f32.mrf.mxu1 }
 0x147   :  { %v245_v1 = vadd.f32 %v244_v63, %v206_v62 }
 0x149   :  { %v259_v8 = vmax.f32 %v245_v1, 0.0 }
 0x14e   :  { %v246_v3 = vpop.f32.mrf.mxu1 }
 0x14f   :  { %v247_v5 = vadd.f32 %v246_v3, %v211_v2 }
 0x151   :  { %v260_v9 = vmax.f32 %v247_v5, 0.0 }
 0x153   :  { %v262_v11 = vpack.c.bf16 %v260_v9, %v259_v8 }
 0x155   :  { %280 = vmatpush.bf16.msra.mxu2 %v262_v11 }
 0x159   :  { %281 = vmatpush.bf16.msra.mxu2 %v261_v13 }
 0x15c   :  { %338 = vmatmul.msk.bf16.vlgmr.msra.gmra.mxu2 %vm270_vm3, %v263_v14 }
 0x1df   :  { %v283_v16 = vpop.f32.mrf.mxu2 }
 0x1e0   :  { %v284_v17 = vadd.f32 %v283_v16, %v268_v15 }
 0x1e2   :  { %287 = vst [vmem:[#allocation2] sm:$0x7] %v284_v17 }
 0x1e3   :  { %298 = dma.vmem_to_hbm [thread:$0]  %s294_s16, 64, %s296_s19, [#allocation3]  }
 0x1e7   :  { %v285_v18 = vpop.f32.mrf.mxu2 }
 0x1e8   :  { %376 = dma.done.wait [#allocation3], 64  }
 0x1e9   :  { %377 = vsyncadd [#allocation3], 4294967232 }
 0x1ea   :  { %303 = vsyncpa [#allocation3], 1 }

</bundles_post_ra>
